<compile_context>
chip_gen: v7x
topology: tpu7x:2x2x1
jax: 0.10.0
libtpu: 0.0.40
codegen_flags: <defaults>
</compile_context>

<pallas_src>
import functools

import jax
import jax.numpy as jnp
from jax.experimental import pallas as pl
from jax.experimental.pallas import tpu as pltpu


def _round_up(x, m):
    return ((x + m - 1) // m) * m


def _log_sigmoid(x):
    # numerically stable logsigmoid(x) = min(x, 0) - log1p(exp(-|x|))
    return jnp.minimum(x, 0.0) - jnp.log1p(jnp.exp(-jnp.abs(x)))


def sgns_loss_kernel(u_ref, pos_ref, negsum_ref, out_ref, acc_ref, *,
                     tile_b, total_b, tiles_per_part, inv_total_b):
    c = pl.program_id(0)          # megacore ("parallel") axis
    i = pl.program_id(1)          # batch-tile reduction ("arbitrary") axis

    @pl.when(i == 0)
    def _init():
        acc_ref[...] = jnp.zeros_like(acc_ref)

    # Stream in native dtype, upcast to f32 in-kernel (VPU work, DMA-hidden).
    vec_u = u_ref[...].astype(jnp.float32)                                 # (TB, D)
    pos_score = jnp.sum(vec_u * pos_ref[...].astype(jnp.float32),
                        axis=1, keepdims=True)                             # (TB, 1)
    neg_score = jnp.sum(vec_u * negsum_ref[...].astype(jnp.float32),
                        axis=1, keepdims=True)                             # (TB, 1)

    # Transcendentals only on (TB, 1) columns (EUP slot, free under DMA).
    loss = -_log_sigmoid(pos_score) - _log_sigmoid(-neg_score)             # (TB, 1)

    tile_lin = c * tiles_per_part + i      # logical (unclamped) tile index
    row0 = tile_lin * tile_b

    @pl.when(row0 + tile_b <= total_b)     # full tile: no mask needed
    def _full():
        acc_ref[...] += jnp.sum(loss).reshape(1, 1)

    @pl.when(row0 + tile_b > total_b)      # ragged / redundant tile: mask rows >= B
    def _ragged():
        row = row0 + jax.lax.broadcasted_iota(jnp.int32, (tile_b, 1), 0)
        acc_ref[...] += jnp.sum(jnp.where(row < total_b, loss, 0.0)).reshape(1, 1)

    @pl.when(i == pl.num_programs(1) - 1)
    def _finalize():
        out_ref[...] = (acc_ref[...] * inv_total_b).reshape(1, 1, 1)


def skipgram_loss(U_w, V_w, u, pos, neg, *, target_tile_b=2048, num_parts=2):
    """Forward pass of SkipGramWordEmbeddings; returns the scalar mean loss."""
    dtype = U_w.dtype
    itemsize = jnp.dtype(dtype).itemsize

    # Embedding-row gathers stay in JAX glue (XLA fuses gather + K-sum into a
    # single pass); no float32 up-cast and no padding copies are made here.
    vec_u = jnp.take(U_w, u, axis=0)                                       # (B, D)
    vec_pos = jnp.take(V_w, pos, axis=0)                                   # (B, D)
    vec_negsum = jnp.take(V_w, neg, axis=0).sum(
        axis=1, dtype=jnp.float32).astype(dtype)                           # (B, D)

    B, D = vec_u.shape

    # Sublane packing: f32 -> 8 rows, bf16 -> 16, int8/fp8 -> 32.
    sub = {4: 8, 2: 16, 1: 32}.get(itemsize, 8)

    # Tile rows from a VMEM budget that is safe on every generation
    # (v7x: 64 MiB physical / 32 MiB default scoped).  3 inputs x 2 buffers.
    vmem_budget = 24 * 1024 * 1024
    max_tb = max(sub, (vmem_budget // (6 * D * itemsize)) // sub * sub)
    tb = min(_round_up(min(target_tile_b, B), sub), max_tb)

    num_tiles = pl.cdiv(B, tb)
    tiles_per_part = pl.cdiv(num_tiles, num_parts)
    grid = (num_parts, tiles_per_part)

    last_block = num_tiles - 1

    def batch_map(c, i):
        # Clamp to the last valid block so redundant megacore tiles never DMA
        # past the array; their contribution is zeroed by the row < B mask.
        return (jnp.minimum(c * tiles_per_part + i, last_block), 0)

    in_spec = pl.BlockSpec((tb, D), batch_map)   # last dim == full D -> lane rule ok

    cost = pl.CostEstimate(
        flops=4 * B * D,
        transcendentals=4 * B,
        bytes_accessed=3 * B * D * itemsize + num_parts * 4,
    )

    partials = pl.pallas_call(
        functools.partial(
            sgns_loss_kernel,
            tile_b=tb, total_b=B, tiles_per_part=tiles_per_part,
            inv_total_b=1.0 / B),
        out_shape=jax.ShapeDtypeStruct((num_parts, 1, 1), jnp.float32),
        grid=grid,
        in_specs=[in_spec, in_spec, in_spec],
        out_specs=pl.BlockSpec((1, 1, 1), lambda c, i: (c, 0, 0)),
        scratch_shapes=[pltpu.VMEM((1, 1), jnp.float32)],
        compiler_params=pltpu.CompilerParams(
            # Leading axis shards across v7x's two TensorCores; the batch-tile
            # axis carries the resident accumulator so it must be "arbitrary".
            dimension_semantics=("parallel", "arbitrary"),
            vmem_limit_bytes=32 * 1024 * 1024,
        ),
        cost_estimate=cost,
    )(vec_u, vec_pos, vec_negsum)

    # Each per-core partial is already divided by B; summing gives the mean.
    return jnp.sum(partials)


if __name__ == "__main__":
    vocab_size = 64
    emb_dimension = 32

    key = jax.random.PRNGKey(0)
    k_u, k_v, k_iu, k_ip, k_in = jax.random.split(key, 5)

    initrange = 1.0 / emb_dimension
    # torch.nn.init.uniform_(U.weight, -initrange, initrange); same for V
    U_w = jax.random.uniform(
        k_u, (vocab_size, emb_dimension), jnp.float32, -initrange, initrange)
    V_w = jax.random.uniform(
        k_v, (vocab_size, emb_dimension), jnp.float32, -initrange, initrange)

    def reference(U_w, V_w, u, pos, neg):
        # pure-JAX reference (same math as the PyTorch module)
        vu = U_w[u].astype(jnp.float32)
        vp = V_w[pos].astype(jnp.float32)
        vn = V_w[neg].astype(jnp.float32)
        s = -jax.nn.log_sigmoid(jnp.sum(vu * vp, axis=1))
        ns = jnp.einsum("bkd,bd->bk", vn, vu).sum(axis=1)
        ns = -jax.nn.log_sigmoid(-ns)
        return jnp.mean(s + ns)

    # Case 1: tiny batch (single tile, block == full array).
    batch, num_neg = 8, 4
    u = jax.random.randint(k_iu, (batch,), 0, vocab_size, dtype=jnp.int32)
    pos = jax.random.randint(k_ip, (batch,), 0, vocab_size, dtype=jnp.int32)
    neg = jax.random.randint(k_in, (batch, num_neg), 0, vocab_size, dtype=jnp.int32)

    loss = skipgram_loss(U_w, V_w, u, pos, neg)
    jax.block_until_ready(loss)
    ref = reference(U_w, V_w, u, pos, neg)
    assert jnp.allclose(loss, ref, rtol=3e-5, atol=1e-6), (loss, ref)

    # Case 2: multi-tile grid, ragged last tile and a redundant megacore tile.
    batch2, num_neg2 = 300, 5
    k_iu2, k_ip2, k_in2 = jax.random.split(k_in, 3)
    u2 = jax.random.randint(k_iu2, (batch2,), 0, vocab_size, dtype=jnp.int32)
    pos2 = jax.random.randint(k_ip2, (batch2,), 0, vocab_size, dtype=jnp.int32)
    neg2 = jax.random.randint(k_in2, (batch2, num_neg2), 0, vocab_size, dtype=jnp.int32)

    loss2 = skipgram_loss(U_w, V_w, u2, pos2, neg2, target_tile_b=64)
    jax.block_until_ready(loss2)
    ref2 = reference(U_w, V_w, u2, pos2, neg2)
    assert jnp.allclose(loss2, ref2, rtol=3e-5, atol=1e-6), (loss2, ref2)

    print("KERNEL_OK")
</pallas_src>

<mosaic_0001>
module attributes {stable_mosaic.version = 11 : i64} {
  func.func @sgns_loss_kernel(%arg0: i32, %arg1: i32, %arg2: memref<8x32xf32, #tpu.memory_space<vmem>>, %arg3: memref<8x32xf32, #tpu.memory_space<vmem>>, %arg4: memref<8x32xf32, #tpu.memory_space<vmem>>, %arg5: memref<1x1x1xf32, #tpu.memory_space<vmem>>, %arg6: memref<1x1xf32, #tpu.memory_space<vmem>>) attributes {dimension_semantics = [#tpu.dimension_semantics<parallel>, #tpu.dimension_semantics<arbitrary>], iteration_bounds = array<i64: 2, 1>, scalar_prefetch = 0 : i64, scratch_operands = 1 : i64, tpu.core_type = #tpu.core_type<tc>, window_params = [{transform_indices = @transform_0, window_bounds = array<i64: 8, 32>}, {transform_indices = @transform_1, window_bounds = array<i64: 8, 32>}, {transform_indices = @transform_2, window_bounds = array<i64: 8, 32>}, {transform_indices = @transform_3, window_bounds = array<i64: 1, 1, 1>}]} {
    %c0_i32 = arith.constant 0 : i32
    %0 = arith.cmpi eq, %arg1, %c0_i32 : i32
    %1 = arith.extui %0 : i1 to i32
    %c0_i32_0 = arith.constant 0 : i32
    %2 = arith.cmpi ne, %1, %c0_i32_0 : i32
    scf.if %2 {
      %cst_21 = arith.constant 0.000000e+00 : f32
      %47 = vector.broadcast %cst_21 : f32 to vector<1x1xf32>
      %c0_22 = arith.constant 0 : index
      %c0_23 = arith.constant 0 : index
      %48 = vector.load %arg6[%c0_22, %c0_23] : memref<1x1xf32, #tpu.memory_space<vmem>>, vector<1x1xf32>
      tpu.vector_store %arg6[%c0_22, %c0_23], %47 {strides = array<i32>} : memref<1x1xf32, #tpu.memory_space<vmem>>, vector<1x1xf32>,
    } else {
    }
    %c0 = arith.constant 0 : index
    %c0_1 = arith.constant 0 : index
    %3 = vector.load %arg2[%c0, %c0_1] : memref<8x32xf32, #tpu.memory_space<vmem>>, vector<8x32xf32>
    %c0_2 = arith.constant 0 : index
    %c0_3 = arith.constant 0 : index
    %4 = vector.load %arg3[%c0_2, %c0_3] : memref<8x32xf32, #tpu.memory_space<vmem>>, vector<8x32xf32>
    %5 = arith.mulf %3, %4 : vector<8x32xf32>
    %cst = arith.constant dense<0.000000e+00> : vector<8xf32>
    %6 = vector.multi_reduction <add>, %5, %cst [1] : vector<8x32xf32> to vector<8xf32>
    %7 = vector.shape_cast %6 : vector<8xf32> to vector<8x1xf32>
    %c0_4 = arith.constant 0 : index
    %c0_5 = arith.constant 0 : index
    %8 = vector.load %arg4[%c0_4, %c0_5] : memref<8x32xf32, #tpu.memory_space<vmem>>, vector<8x32xf32>
    %9 = arith.mulf %3, %8 : vector<8x32xf32>
    %cst_6 = arith.constant dense<0.000000e+00> : vector<8xf32>
    %10 = vector.multi_reduction <add>, %9, %cst_6 [1] : vector<8x32xf32> to vector<8xf32>
    %11 = vector.shape_cast %10 : vector<8xf32> to vector<8x1xf32>
    %cst_7 = arith.constant 0.000000e+00 : f32
    %12 = vector.broadcast %cst_7 : f32 to vector<8x1xf32>
    %13 = arith.minimumf %7, %12 : vector<8x1xf32>
    %14 = math.absf %7 : vector<8x1xf32>
    %cst_8 = arith.constant 0.000000e+00 : f32
    %15 = vector.broadcast %cst_8 : f32 to vector<8x1xf32>
    %16 = arith.subf %15, %14 : vector<8x1xf32>
    %17 = math.exp %16 : vector<8x1xf32>
    %18 = math.log1p %17 : vector<8x1xf32>
    %19 = arith.subf %13, %18 : vector<8x1xf32>
    %cst_9 = arith.constant 0.000000e+00 : f32
    %20 = vector.broadcast %cst_9 : f32 to vector<8x1xf32>
    %21 = arith.subf %20, %19 : vector<8x1xf32>
    %cst_10 = arith.constant 0.000000e+00 : f32
    %22 = vector.broadcast %cst_10 : f32 to vector<8x1xf32>
    %23 = arith.subf %22, %11 : vector<8x1xf32>
    %cst_11 = arith.constant 0.000000e+00 : f32
    %24 = vector.broadcast %cst_11 : f32 to vector<8x1xf32>
    %25 = arith.minimumf %23, %24 : vector<8x1xf32>
    %26 = math.absf %23 : vector<8x1xf32>
    %cst_12 = arith.constant 0.000000e+00 : f32
    %27 = vector.broadcast %cst_12 : f32 to vector<8x1xf32>
    %28 = arith.subf %27, %26 : vector<8x1xf32>
    %29 = math.exp %28 : vector<8x1xf32>
    %30 = math.log1p %29 : vector<8x1xf32>
    %31 = arith.subf %25, %30 : vector<8x1xf32>
    %32 = arith.subf %21, %31 : vector<8x1xf32>
    %c1_i32 = arith.constant 1 : i32
    %33 = arith.muli %arg0, %c1_i32 : i32
    %34 = arith.addi %33, %arg1 : i32
    %c8_i32 = arith.constant 8 : i32
    %35 = arith.muli %34, %c8_i32 : i32
    %c8_i32_13 = arith.constant 8 : i32
    %36 = arith.addi %35, %c8_i32_13 : i32
    %c8_i32_14 = arith.constant 8 : i32
    %37 = arith.cmpi sle, %36, %c8_i32_14 : i32
    %38 = arith.extui %37 : i1 to i32
    %c0_i32_15 = arith.constant 0 : i32
    %39 = arith.cmpi ne, %38, %c0_i32_15 : i32
    scf.if %39 {
      %c0_21 = arith.constant 0 : index
      %c0_22 = arith.constant 0 : index
      %47 = vector.load %arg6[%c0_21, %c0_22] : memref<1x1xf32, #tpu.memory_space<vmem>>, vector<1x1xf32>
      %48 = vector.shape_cast %32 : vector<8x1xf32> to vector<1x8x1xf32>
      %cst_23 = arith.constant dense<0.000000e+00> : vector<1xf32>
      %49 = vector.multi_reduction <add>, %48, %cst_23 [1, 2] : vector<1x8x1xf32> to vector<1xf32>
      %50 = vector.shape_cast %49 : vector<1xf32> to vector<1x1x1xf32>
      %51 = vector.extract %50[0, 0, 0] : f32 from vector<1x1x1xf32>
      %52 = vector.broadcast %51 : f32 to vector<1x1xf32>
      %53 = arith.addf %47, %52 : vector<1x1xf32>
      %c0_24 = arith.constant 0 : index
      %c0_25 = arith.constant 0 : index
      %54 = vector.load %arg6[%c0_24, %c0_25] : memref<1x1xf32, #tpu.memory_space<vmem>>, vector<1x1xf32>
      tpu.vector_store %arg6[%c0_24, %c0_25], %53 {strides = array<i32>} : memref<1x1xf32, #tpu.memory_space<vmem>>, vector<1x1xf32>,
    } else {
    }
    %c8_i32_16 = arith.constant 8 : i32
    %40 = arith.addi %35, %c8_i32_16 : i32
    %c8_i32_17 = arith.constant 8 : i32
    %41 = arith.cmpi sgt, %40, %c8_i32_17 : i32
    %42 = arith.extui %41 : i1 to i32
    %c0_i32_18 = arith.constant 0 : i32
    %43 = arith.cmpi ne, %42, %c0_i32_18 : i32
    scf.if %43 {
      %47 = tpu.iota {dimensions = array<i32: 0>} : vector<8x1xi32>
      %48 = vector.broadcast %35 : i32 to vector<8x1xi32>
      %49 = arith.addi %48, %47 : vector<8x1xi32>
      %c0_21 = arith.constant 0 : index
      %c0_22 = arith.constant 0 : index
      %50 = vector.load %arg6[%c0_21, %c0_22] : memref<1x1xf32, #tpu.memory_space<vmem>>, vector<1x1xf32>
      %c8_i32_23 = arith.constant 8 : i32
      %51 = vector.broadcast %c8_i32_23 : i32 to vector<8x1xi32>
      %52 = arith.cmpi slt, %49, %51 : vector<8x1xi32>
      %cst_24 = arith.constant 0.000000e+00 : f32
      %53 = vector.broadcast %cst_24 : f32 to vector<8x1xf32>
      %54 = arith.select %52, %32, %53 : vector<8x1xi1>, vector<8x1xf32>
      %55 = vector.shape_cast %54 : vector<8x1xf32> to vector<1x8x1xf32>
      %cst_25 = arith.constant dense<0.000000e+00> : vector<1xf32>
      %56 = vector.multi_reduction <add>, %55, %cst_25 [1, 2] : vector<1x8x1xf32> to vector<1xf32>
      %57 = vector.shape_cast %56 : vector<1xf32> to vector<1x1x1xf32>
      %58 = vector.extract %57[0, 0, 0] : f32 from vector<1x1x1xf32>
      %59 = vector.broadcast %58 : f32 to vector<1x1xf32>
      %60 = arith.addf %50, %59 : vector<1x1xf32>
      %c0_26 = arith.constant 0 : index
      %c0_27 = arith.constant 0 : index
      %61 = vector.load %arg6[%c0_26, %c0_27] : memref<1x1xf32, #tpu.memory_space<vmem>>, vector<1x1xf32>
      tpu.vector_store %arg6[%c0_26, %c0_27], %60 {strides = array<i32>} : memref<1x1xf32, #tpu.memory_space<vmem>>, vector<1x1xf32>,
    } else {
    }
    %c0_i32_19 = arith.constant 0 : i32
    %44 = arith.cmpi eq, %arg1, %c0_i32_19 : i32
    %45 = arith.extui %44 : i1 to i32
    %c0_i32_20 = arith.constant 0 : i32
    %46 = arith.cmpi ne, %45, %c0_i32_20 : i32
    scf.if %46 {
      %c0_21 = arith.constant 0 : index
      %c0_22 = arith.constant 0 : index
      %47 = vector.load %arg6[%c0_21, %c0_22] : memref<1x1xf32, #tpu.memory_space<vmem>>, vector<1x1xf32>
      %cst_23 = arith.constant 1.250000e-01 : f32
      %48 = vector.broadcast %cst_23 : f32 to vector<1x1xf32>
      %49 = arith.mulf %47, %48 : vector<1x1xf32>
      %50 = vector.shape_cast %49 : vector<1x1xf32> to vector<1x1x1xf32>
      %c0_24 = arith.constant 0 : index
      %c0_25 = arith.constant 0 : index
      %c0_26 = arith.constant 0 : index
      %51 = vector.load %arg5[%c0_24, %c0_25, %c0_26] : memref<1x1x1xf32, #tpu.memory_space<vmem>>, vector<1x1x1xf32>
      tpu.vector_store %arg5[%c0_24, %c0_25, %c0_26], %50 {strides = array<i32>} : memref<1x1x1xf32, #tpu.memory_space<vmem>>, vector<1x1x1xf32>,
    } else {
    }
    return
  }
  func.func @transform_0(%arg0: i32, %arg1: i32) -> (i32, i32) {
    %c1_i32 = arith.constant 1 : i32
    %0 = arith.muli %arg0, %c1_i32 : i32
    %1 = arith.addi %0, %arg1 : i32
    %c0_i32 = arith.constant 0 : i32
    %2 = arith.minsi %1, %c0_i32 : i32
    %c0_i32_0 = arith.constant 0 : i32
    %c0_i32_1 = arith.constant 0 : i32
    return %2, %c0_i32_0 : i32, i32
  }
  func.func @transform_1(%arg0: i32, %arg1: i32) -> (i32, i32) {
    %c1_i32 = arith.constant 1 : i32
    %0 = arith.muli %arg0, %c1_i32 : i32
    %1 = arith.addi %0, %arg1 : i32
    %c0_i32 = arith.constant 0 : i32
    %2 = arith.minsi %1, %c0_i32 : i32
    %c0_i32_0 = arith.constant 0 : i32
    %c0_i32_1 = arith.constant 0 : i32
    return %2, %c0_i32_0 : i32, i32
  }
  func.func @transform_2(%arg0: i32, %arg1: i32) -> (i32, i32) {
    %c1_i32 = arith.constant 1 : i32
    %0 = arith.muli %arg0, %c1_i32 : i32
    %1 = arith.addi %0, %arg1 : i32
    %c0_i32 = arith.constant 0 : i32
    %2 = arith.minsi %1, %c0_i32 : i32
    %c0_i32_0 = arith.constant 0 : i32
    %c0_i32_1 = arith.constant 0 : i32
    return %2, %c0_i32_0 : i32, i32
  }
  func.func @transform_3(%arg0: i32, %arg1: i32) -> (i32, i32, i32) {
    %c0_i32 = arith.constant 0 : i32
    %c0_i32_0 = arith.constant 0 : i32
    %c0_i32_1 = arith.constant 0 : i32
    return %arg0, %c0_i32, %c0_i32_0 : i32, i32, i32
  }
}

</mosaic_0001>

<bundles_post_ra>
// kernel: tpu_custom_call.1
= control target key start
LH: loop header
LB: loop body
LE: loop exit
PB: predicated region body
PF: predicated region fallthrough
CT: control target
= control target key end

     0   :  { %8 = vsyncpa [#allocation4], 0  ;;  %s951_s0 = inlined_call_operand.hbm [shape: f32[8,32], index: 0, kind: input, shape index: {}]   ;;  %s952_s1 = inlined_call_operand.hbm [shape: f32[8,32], index: 1, kind: input, shape index: {}]   ;;  %s953_s2 = inlined_call_operand.hbm [shape: f32[8,32], index: 2, kind: input, shape index: {}]   ;;  %s954_s3 = inlined_call_operand.vmem [shape: f32[2,1,1], index: 3, kind: output, shape index: {}]  }
   0x1   :  { %10 = vsyncpa [#allocation4 + $0x1], 0 }
   0x2   :  { %11 = vsyncpa [#allocation6], 0 }
   0x3   :  { %13 = vsyncpa [#allocation6 + $0x1], 0  ;;  %s784_s12 = smov 0   ;;  %s786_s13 = smov 0  }
   0x4   :  { %s788_s14 = smov 0   ;;  %s790_s15 = smov 0  }
   0x5   :  { %s792_s16 = smov 0  }
   0x6 LB: > { %s520_s17 = sadd.s32 4294967295, %s758_s16   ;;  %s31_s18 = sadd.s32 1, %s754_s15  ;;  %s758_s16 = sphi %s792_s16, %s19_s16   ;;  %s754_s15 = sphi %s790_s15, %s970_s15   ;;  %s750_s14 = sphi %s788_s14, %s969_s14   ;;  %s746_s13 = sphi %s786_s13, %s941_s13   ;;  %s742_s12 = sphi %s784_s12, %s968_s12  }
   0x7   : > { %p33_p0 = scmp.ge.s32.totalorder %s31_s18, 2  ;;  %p739_p1 = scmp.ne.s32.totalorder %s746_s13, 0 }
   0x8   : > { %p52_p2 = scmp.eq.s32.totalorder %s758_s16, 0  ;;  %p57_p3 = scmp.ne.s32.totalorder %s746_s13, %s742_s12 }
   0x9   : > { %s972_s18 = smov (%p33_p0, %s31_s18), 0  ;;  %p58_p4 = scmp.eq.s32.totalorder %s520_s17, 0 }
   0xa   : > { %p53_p5 = por %p739_p1, %p52_p2  ;;  %p559_p7 = scmp.lt.s32.totalorder %s758_s16, 2 }
   0xb   : > { %p816_p6 = por %p58_p4, %p57_p3  ;;  %s192_s21 = sand.u32 1, %s758_s16  }
   0xc   : > { %p821_p8 = pnand %p559_p7, %p53_p5  ;;  %s760_s22 = smov [#allocation5]  }
   0xd   : > { %s958_s19 = scalar_select %p816_p6, 1, 0 }
   0xe   : > { %s959_s20 = scalar_select %p821_p8, 1, 0 }
   0xf   : > { %s206_s23 = sshll.u32 %s760_s22, 4  ;;  %s827_s24 = scalar_lea.sflag [#allocation6], %s192_s21  ;;  %s207_s23 = int_to_ptr.vmem [resolvable:$true] %s206_s23 }
  0x10   : > { %s617_s27 = scalar_lea.hbm %s952_s1, 128  ;;  %p837_p11 = pneg %p821_p8 }
  0x11   : > { %p618_p10 = scmp.ne.s32.totalorder %s952_s1, %s617_s27  ;;  %p624_p0 = scmp.lt.u32.totalorder %s617_s27, %s617_s27 }
  0x12   : > { %p626_p1 = scmp.lt.u32.totalorder %s617_s27, %s952_s1 }
  0x13   : > { %p620_p12 = pnand %p837_p11, %p618_p10 }
  0x14   : > { %p627_p2 = por %p626_p1, %p624_p0 }
  0x15   : > { %p621_p13 = pneg %p620_p12 }
  0x17   : > { %p628_p3 = pnand %p627_p2, %p621_p13 }
  0x19   : > { %631 = shalt.err (!%p628_p3)
}
  0x1a   : > { %s632_s6 = scalar_lea.vmem %s207_s23, 128  ;;  %s639_s7 = scalar_lea.vmem %s207_s23, 256 }
  0x1b   : > { %p633_p4 = scmp.ne.s32.totalorder %s207_s23, %s632_s6  ;;  %p640_p9 = scmp.lt.s32.totalorder %s207_s23, %s207_s23 }
  0x1c   : > { %p641_p6 = scmp.lt.s32.totalorder %s639_s7, %s632_s6 }
  0x1d   : > { %p635_p5 = pnand %p633_p4, %p837_p11 }
  0x1e   : > { %p642_p8 = por %p641_p6, %p640_p9 }
  0x1f   : > { %p636_p7 = pneg %p635_p5 }
  0x21   : > { %p643_p10 = pnand %p642_p8, %p636_p7 }
  0x23   : > { %646 = shalt.err (!%p643_p10)
}
  0x24   : > { %p961_p12 = scmp.ne.s32.totalorder %s959_s20, 0  ;;  %p232_p13 = scmp.lt.s32.totalorder %s758_s16, 3 }
  0x25   : > { %p962_p0 = scmp.ge.s32.totalorder %s758_s16, 1  ;;  %s761_s11 = smov [#allocation3]  }
  0x26   : > { %555 = dma.hbm_to_vmem [thread:$0]  (!%p961_p12), %s952_s1, 128, %s207_s23, %s827_s24  }
  0x27   : > { %p857_p1 = pnand %p962_p0, %p232_p13  ;;  %s185_s12 = sshll.u32 %s761_s11, 4  ;;  %s186_s12 = int_to_ptr.vmem [resolvable:$true] %s185_s12 }
  0x28   : > { %s647_s25 = scalar_lea.hbm %s951_s0, 128 }
  0x29   : > { %s963_s10 = scalar_select %p857_p1, 1, 0 }
  0x2a   : > { %p648_p6 = scmp.ne.s32.totalorder %s951_s0, %s647_s25  ;;  %p654_p2 = scmp.lt.u32.totalorder %s647_s25, %s647_s25 }
  0x2b   : > { %p656_p3 = scmp.lt.u32.totalorder %s647_s25, %s951_s0 }
  0x2c   : > { %p650_p8 = pnand %p648_p6, %p837_p11 }
  0x2d   : > { %p657_p4 = por %p656_p3, %p654_p2 }
  0x2e   : > { %p651_p9 = pneg %p650_p8 }
  0x30   : > { %p658_p5 = pnand %p657_p4, %p651_p9 }
  0x32   : > { %661 = shalt.err (!%p658_p5)
}
  0x33   : > { %s662_s29 = scalar_lea.vmem %s186_s12, 128  ;;  %s669_s4 = scalar_lea.vmem %s186_s12, 256 }
  0x34   : > { %p663_p7 = scmp.ne.s32.totalorder %s186_s12, %s662_s29  ;;  %p670_p0 = scmp.lt.s32.totalorder %s186_s12, %s186_s12 }
  0x35   : > { %p671_p1 = scmp.lt.s32.totalorder %s669_s4, %s662_s29 }
  0x36   : > { %p665_p10 = pnand %p663_p7, %p837_p11 }
  0x37   : > { %p672_p12 = por %p671_p1, %p670_p0 }
  0x38   : > { %p666_p13 = pneg %p665_p10 }
  0x3a   : > { %p673_p6 = pnand %p672_p12, %p666_p13 }
  0x3c   : > { %676 = shalt.err (!%p673_p6)
}
  0x3d   : > { %p964_p8 = scmp.ne.s32.totalorder %s959_s20, 0  ;;  %s762_s7 = smov [#allocation7]  }
  0x3e   : > { %s227_s8 = sshll.u32 %s762_s7, 4  ;;  %s677_s21 = scalar_lea.hbm %s953_s2, 128  ;;  %s228_s8 = int_to_ptr.vmem [resolvable:$true] %s227_s8 }
  0x3f   : > { %552 = dma.hbm_to_vmem [thread:$0]  (!%p964_p8), %s951_s0, 128, %s186_s12, [#allocation4]  }
  0x40   : > { %p678_p1 = scmp.ne.s32.totalorder %s953_s2, %s677_s21  ;;  %p684_p2 = scmp.lt.u32.totalorder %s677_s21, %s677_s21 }
  0x41   : > { %p686_p3 = scmp.lt.u32.totalorder %s677_s21, %s953_s2 }
  0x42   : > { %p680_p12 = pnand %p678_p1, %p837_p11 }
  0x43   : > { %p687_p4 = por %p686_p3, %p684_p2 }
  0x44   : > { %p681_p9 = pneg %p680_p12 }
  0x46   : > { %p688_p5 = pnand %p687_p4, %p681_p9 }
  0x48   : > { %691 = shalt.err (!%p688_p5)
}
  0x49   : > { %s692_s12 = scalar_lea.vmem %s228_s8, 128  ;;  %s699_s23 = scalar_lea.vmem %s228_s8, 256 }
  0x4a   : > { %p693_p7 = scmp.ne.s32.totalorder %s228_s8, %s692_s12  ;;  %p700_p0 = scmp.lt.s32.totalorder %s228_s8, %s228_s8 }
  0x4b   : > { %p701_p6 = scmp.lt.s32.totalorder %s699_s23, %s692_s12 }
  0x4c   : > { %p695_p10 = pnand %p693_p7, %p837_p11 }
  0x4d   : > { %p702_p8 = por %p701_p6, %p700_p0 }
  0x4e   : > { %p696_p13 = pneg %p695_p10 }
  0x50   : > { %p703_p1 = pnand %p702_p8, %p696_p13 }
  0x52   : > { %706 = shalt.err (!%p703_p1)
}
  0x53   : > { %p965_p12 = scmp.ne.s32.totalorder %s959_s20, 0  ;;  %p966_p9 = scmp.ne.s32.totalorder %s963_s10, 0 }
  0x54   : > { %s238_s30 = sand.u32 (!%p966_p9), 1, %s746_s13   ;;  %p967_p11 = scmp.ne.s32.totalorder (!%p966_p9), %s958_s19, 0 }
  0x55   : > { %558 = dma.hbm_to_vmem [thread:$0]  (!%p965_p12), %s953_s2, 128, %s228_s8, %s827_s24  }
  0x56   : > { %236 = sbr.rel (%p966_p9) target bundleno = 723 (0x2d3), region = 32  ;;  %s531_s4 = sshll.u32 (!%p966_p9), %s238_s30, 3 }
  0x57   : > { %s239_s5 = scalar_lea.sflag (!%p966_p9), [#allocation4], %s238_s30  ;;  %s242_s6 = scalar_lea.vmem (!%p966_p9), [#allocation3], %s531_s4 }
  0x5d   : > { %732 = dma.done.wait (%p967_p11), %s239_s5, 128  }
  0x5e   : > { %734 = vsyncadd (%p967_p11), %s239_s5, 4294967168  ;;  %s247_s20 = sand.u32 1, %s520_s17   ;;  %s251_s24 = scalar_lea.vmem [#allocation5], %s531_s4 }
  0x5f   : > { %s248_s7 = scalar_lea.sflag [#allocation6], %s247_s20 }
  0x60   : > { %736 = dma.done.wait (%p967_p11), %s248_s7, 256  }
  0x61   : > { %738 = vsyncadd (%p967_p11), %s248_s7, 4294967040  ;;  %vm307_vm0 = vcmask 0   ;;  %v763_v0 = vmov 0.0   ;;  %v309_v1 = vld [vmem:[%s242_s6] sm:$0xff]  ;;  %v310_v2 = vld [vmem:[%s251_s24] sm:$0xff]  ;;  %vm312_vm1 = vcmask 261120  }
  0x62   : > { %308 = vst.msk [vmem:[#allocation2] sm:$0x1] %vm307_vm0, %v763_v0  ;;  %s260_s10 = scalar_lea.vmem [#allocation7], %s531_s4  ;;  %v311_v4 = vmul.f32 %v310_v2, %v309_v1  ;;  %p300_p8 = scmp.lt.s32.totalorder %s750_s14, 1 }
  0x63   : > { %v316_v3 = vld [vmem:[%s260_s10] sm:$0xff]  ;;  %s534_s19 = sshll.u32 %s750_s14, 3 }
  0x64   : > { %v317_v5 = vmul.f32 %v316_v3, %v309_v1  ;;  %v313_v6 = vsel %vm312_vm1, %v311_v4, 0.0  ;;  %s914_s17 = scalar_select %p300_p8, %s750_s14, 1 }
  0x65   : > { %314 = vadd.xlane.f32.xlu0 %v313_v6  ;;  %s923_s21 = sadd.s32 8, %s534_s19 }
  0x66   : > { %v318_v7 = vsel %vm312_vm1, %v317_v5, 0.0  ;;  %s302_s11 = scalar_lea.vmem %s954_s3, %s914_s17  ;;  %p535_p2 = scmp.gt.s32.totalorder %s923_s21, 8 }
  0x67   : > { %vm362_vm4 = vcmask (!%p535_p2), 7168  }
  0x69   : > { %319 = vadd.xlane.f32.xlu0 %v318_v7  ;;  %v361_v49 = vld [vmem:[#allocation2] sm:$0x1] (!%p535_p2) }
  0xf2   : > { %v315_v8 = vpop.xlane.xlu0 %314 }
  0xf3   : > { %v322_v9 = vand.u32 2147483647, %v315_v8  ;;  %v321_v30 = vmin.f32 %v315_v8, 0.0 }
  0xf5   : > { %v323_v10 = vsub.f32 0.0, %v322_v9 }
  0xf6   : > { %v320_v11 = vpop.xlane.xlu0 %319 }
  0xf7   : > { %v324_v12 = vmul.f32 1.442695, %v323_v10  ;;  %v337_v13 = vsub.f32 0.0, %v320_v11 }
  0xf9   : > { %609 = vpow2.f32 %v324_v12  ;;  %v339_v14 = vand.u32 2147483647, %v337_v13  ;;  %v338_v36 = vmin.f32 %v337_v13, 0.0 }
  0xfb   : > { %v340_v15 = vsub.f32 0.0, %v339_v14 }
  0xfd   : > { %v341_v16 = vmul.f32 1.442695, %v340_v15 }
  0xff   : > { %611 = vpow2.f32 %v341_v16 }
 0x103   : > { %v610_v17 = vpop.eup %609 }
 0x104   : > { %v326_v18 = vadd.f32 1.0, %v610_v17  ;;  %v329_v20 = vmul.f32 -0.5, %v610_v17  ;;  %v332_v23 = vand.u32 2147483647, %v610_v17 }
 0x106   : > { %613 = vlog2.f32 %v326_v18  ;;  %v330_v22 = vadd.f32 1.0, %v329_v20  ;;  %vm333_vm2 = vcmp.lt.f32.partialorder %v332_v23, 0.0004427343 }
 0x108   : > { %v331_v27 = vmul.f32 %v610_v17, %v330_v22 }
 0x109   : > { %v612_v19 = vpop.eup %611 }
 0x10a   : > { %v343_v21 = vadd.f32 1.0, %v612_v19  ;;  %v346_v24 = vmul.f32 -0.5, %v612_v19  ;;  %v349_v31 = vand.u32 2147483647, %v612_v19 }
 0x10c   : > { %615 = vlog2.f32 %v343_v21  ;;  %v347_v29 = vadd.f32 1.0, %v346_v24  ;;  %vm350_vm3 = vcmp.lt.f32.partialorder %v349_v31, 0.0004427343 }
 0x10e   : > { %v348_v35 = vmul.f32 %v612_v19, %v347_v29 }
 0x110   : > { %v614_v25 = vpop.eup %613 }
 0x111   : > { %v328_v26 = vmul.f32 0.6931472, %v614_v25 }
 0x113   : > { %v334_v28 = vsel %vm333_vm2, %v331_v27, %v328_v26 }
 0x114   : > { %v335_v33 = vsub.f32 %v321_v30, %v334_v28 }
 0x116   : > { %v616_v32 = vpop.eup %615  ;;  %v336_v38 = vsub.f32 0.0, %v335_v33  ;;  %360 = sbr.rel (%p535_p2) target bundleno = 495 (0x1ef), region = 52 }
 0x117   : > { %v345_v34 = vmul.f32 0.6931472, %v616_v32 }
 0x119   : > { %v351_v37 = vsel %vm350_vm3, %v348_v35, %v345_v34 }
 0x11a   : > { %v352_v39 = vsub.f32 %v338_v36, %v351_v37 }
 0x11c   : > { %v353_v40 = vsub.f32 %v336_v38, %v352_v39 }
 0x11e   : > { %v363_v41 = vsel %vm362_vm4, %v353_v40, 0.0 }
 0x11f   : > { %364 = vadd.xlane.f32.xlu0 %v363_v41 }
 0x1ac   : > { %v365_v42 = vpop.xlane.xlu0 %364 }
 0x1ad   : > { %v366_v43 = vrot.slane %v365_v42, 4 }
 0x1af   : > { %v367_v44 = vadd.f32 %v366_v43, %v365_v42 }
 0x1b1   : > { %v368_v45 = vrot.slane %v367_v44, 2 }
 0x1b3   : > { %v369_v46 = vadd.f32 %v368_v45, %v367_v44 }
 0x1b5   : > { %v370_v47 = vrot.slane %v369_v46, 1 }
 0x1b7   : > { %v371_v48 = vadd.f32 %v370_v47, %v369_v46 }
 0x1b9   : > { %539 = vpush %v371_v48 }
 0x1ea   : > { %s540_s22 = spop %539 }
 0x1eb   : > { %v373_v50 = vstv %s540_s22 }
 0x1ec   : > { %v374_v51 = vadd.f32 %v373_v50, %v361_v49 }
 0x1ee   : > { %376 = vst.msk [vmem:[#allocation2] sm:$0x1] %vm307_vm0, %v374_v51 }
 0x1ef PF: > { %p536_p3 = scmp.le.s32.totalorder %s923_s21, 8 }
 0x1f0   : > { %v381_v52 = vlaneseq (!%p536_p3)  ;;  %v383_v53 = vstv (!%p536_p3), %s534_s19  ;;  %vm388_vm5 = vcmask (!%p536_p3), 7168  }
 0x1f1   : > { %380 = sbr.rel (%p536_p3) target bundleno = 713 (0x2c9), region = 56 }
 0x1f2   : > { %v382_v54 = vshrl.u32 (!%p536_p3), %v381_v52, 7 }
 0x1f4   : > { %v384_v55 = vadd.s32 (!%p536_p3), %v383_v53, %v382_v54 }
 0x1f5   : > { %v385_v1 = vld [vmem:[#allocation2] sm:$0x1] (!%p536_p3) }
 0x1f6   : > { %vm386_vm6 = vcmp.lt.s32.totalorder (!%p536_p3), %v384_v55, 8 }
 0x1f7   : > { %v387_v56 = vsel (!%p536_p3), %vm386_vm6, %v353_v40, 0.0 }
 0x1f8   : > { %v389_v57 = vsel %vm388_vm5, %v387_v56, 0.0 }
 0x1f9   : > { %390 = vadd.xlane.f32.xlu0 %v389_v57 }
 0x286   : > { %v391_v58 = vpop.xlane.xlu0 %390 }
 0x287   : > { %v392_v59 = vrot.slane %v391_v58, 4 }
 0x289   : > { %v393_v60 = vadd.f32 %v392_v59, %v391_v58 }
 0x28b   : > { %v394_v61 = vrot.slane %v393_v60, 2 }
 0x28d   : > { %v395_v62 = vadd.f32 %v394_v61, %v393_v60 }
 0x28f   : > { %v396_v63 = vrot.slane %v395_v62, 1 }
 0x291   : > { %v397_v0 = vadd.f32 %v396_v63, %v395_v62 }
 0x293   : > { %541 = vpush %v397_v0 }
 0x2c4   : > { %s542_s25 = spop %541 }
 0x2c5   : > { %v399_v2 = vstv %s542_s25 }
 0x2c6   : > { %v400_v3 = vadd.f32 %v399_v2, %v385_v1 }
 0x2c8   : > { %402 = vst.msk [vmem:[#allocation2] sm:$0x1] %vm307_vm0, %v400_v3 }
 0x2c9 PF:  {}
 0x2cf   : > { %v406_v4 = vld [vmem:[#allocation2] sm:$0x1] }
 0x2d0   : > { %v407_v5 = vmul.f32 0.125, %v406_v4 }
 0x2d2   : > { %409 = vst.msk [vmem:[%s302_s11] sm:$0x1] %vm307_vm0, %v407_v5 }
 0x2d3 PF: > { %s19_s16 = sadd.s32 1, %s758_s16   ;;  %s968_s12 = smov %s746_s13 }
 0x2d4   : > { %p16_p4 = scmp.ge.s32.totalorder %s19_s16, 4   ;;  %s941_s13 = smov 0  }
 0x2d5   : > { %s969_s14 = smov %s754_s15  ;;  %s970_s15 = smov %s972_s18 }
 0x2d6   :  { %18 = sbr.rel (!%p16_p4) target bundleno = 6 (0x6), region = 112 }
 0x2dd   :  { %427 = vsyncpa [#allocation4], 1 }
 0x2de   :  { %429 = vsyncpa [#allocation4 + $0x1], 1 }
 0x2df   :  { %430 = vsyncpa [#allocation6], 1 }
 0x2e0   :  { %432 = vsyncpa [#allocation6 + $0x1], 1 }

</bundles_post_ra>
